<compile_context>
chip_gen: v5e
topology: v5e:2x2
jax: 0.10.0
libtpu: 0.0.40
codegen_flags: <defaults>
</compile_context>

<pallas_src>
import functools

import jax
import jax.numpy as jnp
import numpy as np
from jax.experimental import pallas as pl
from jax.experimental.pallas import tpu as pltpu


def _cdiv(a: int, b: int) -> int:
    return -(-a // b)


def _round_up(x: int, m: int) -> int:
    return ((x + m - 1) // m) * m


def _mxu_lane_width() -> int:
    """256 on 256x256-MXU parts (v6e / v7x / Trillium), 128 otherwise (v5e and older)."""
    try:
        kind = jax.devices()[0].device_kind.lower()
    except Exception:
        return 128
    if any(s in kind for s in ("v6", "v7", "7x", "trillium")):
        return 256
    return 128


def _time_embedding_kernel(t_ref, e_ref, bp_ref, w_ref, out_ref, *, d: int, g: int):
    # t_ref:   (bn, G)   G packed time points per row (group-major output packing)
    # e_ref:   (G, W)    expansion/scale matrix: E[gg, gg*D + j] = wp_aug[j]
    # bp_ref:  (1, W)    fused bias row, group-major, tiled G times
    # w_ref:   (W, W)    block-diagonal fused weight; each DxD block: zero row/col 0, A^T in [1:,1:]
    # out_ref: (bn, W)   lane-dense output slab; W = G * D
    w = out_ref.shape[1]

    if g == 1:
        # Degenerate packing (D does not divide the lane width): plain broadcast, no MXU.
        phase = t_ref[...] * e_ref[...] + bp_ref[...]
    else:
        # Group-major lane expansion + per-feature scale in one small MXU pass
        # (contraction dim = G).  E has exactly one nonzero per column, so
        # phase[:, gg*D + j] = t[:, gg] * wp_aug[j] to f32 multi-pass accuracy.
        phase = jnp.dot(t_ref[...], e_ref[...],
                        preferred_element_type=jnp.float32) + bp_ref[...]

    s = jnp.sin(phase)                                                   # EUP slot
    per = jnp.dot(s, w_ref[...], preferred_element_type=jnp.float32)    # MXU; linear lanes -> exact 0

    # Linear feature lives at lane j == 0 of every D-wide group and equals the phase
    # itself (t*w_lin + b_lin).  `per` is exactly zero there (zero column per block in
    # w_ref), so a masked add suffices.  Mask built at (1, W), broadcast along rows.
    lane = jax.lax.broadcasted_iota(jnp.int32, (1, w), 1)
    lin_mask = (lane % d == 0).astype(jnp.float32)
    out_ref[...] = (per + phase * lin_mask).astype(out_ref.dtype)


def time_embedding_forward(t, w_lin, b_lin, w_per, b_per, w_A, *, max_block_rows=2048):
    """t: [B, L] float32. Returns [B, L, D] with D = out_features (eval-mode dropout)."""
    B, L = t.shape
    N = B * L
    Dm1 = w_per.shape[0]
    D = Dm1 + 1
    f32 = jnp.float32

    # --- lane packing: G time points per W-wide row, W matched to the chip's MXU ---
    mxu_w = _mxu_lane_width()
    if D <= mxu_w and mxu_w % D == 0:
        G = mxu_w // D
    elif D <= 128 and 128 % D == 0:
        G = 128 // D
    else:
        G = 1  # correct but lane-sparse (masked) stores; slow fallback when D !| 128
    W = G * D

    wp_aug = jnp.concatenate([w_lin.reshape(1), w_per.reshape(Dm1)]).astype(f32)   # (D,)
    bp_aug = jnp.concatenate([b_lin.reshape(1), b_per.reshape(Dm1)]).astype(f32)   # (D,)
    bp_row = jnp.tile(bp_aug, G).reshape(1, W)
    e_mat = jnp.kron(jnp.eye(G, dtype=f32), wp_aug.reshape(1, D))                  # (G, W)
    w_hat = jnp.zeros((D, D), f32).at[1:, 1:].set(w_A.T.astype(f32))               # zero row/col 0
    w_big = jnp.kron(jnp.eye(G, dtype=f32), w_hat)                                 # (W, W) block-diag

    # --- tight block sizing (pad < 8 rows); >= 2 blocks so v7x dual-TCs both engage ---
    rows = _cdiv(N, G)
    n_blocks = max(_cdiv(rows, max_block_rows), 2 if rows > 16 else 1)
    block_rows = _round_up(_cdiv(rows, n_blocks), 8)     # (8, 128) sublane constraint
    n_blocks = _cdiv(rows, block_rows)
    rows_pad = n_blocks * block_rows
    n_pad = rows_pad * G

    t_flat = t.reshape(N).astype(f32)
    if n_pad > N:
        t_flat = jnp.pad(t_flat, (0, n_pad - N))
    t2 = t_flat.reshape(rows_pad, G)

    kernel = functools.partial(_time_embedding_kernel, d=D, g=G)

    out = pl.pallas_call(
        kernel,
        out_shape=jax.ShapeDtypeStruct((rows_pad, W), f32),
        grid_spec=pltpu.PrefetchScalarGridSpec(
            num_scalar_prefetch=0,
            grid=(n_blocks,),
            in_specs=[
                pl.BlockSpec((block_rows, G), lambda i: (i, 0)),   # packed time points
                pl.BlockSpec((G, W), lambda i: (0, 0)),            # expansion/scale matrix
                pl.BlockSpec((1, W), lambda i: (0, 0)),            # fused bias row
                pl.BlockSpec((W, W), lambda i: (0, 0)),            # block-diag fused A^T
            ],
            out_specs=pl.BlockSpec((block_rows, W), lambda i: (i, 0)),
        ),
        compiler_params=pltpu.CompilerParams(
            dimension_semantics=("parallel",),   # megacore / v7x dual-TC sharding
        ),
    )(t2, e_mat, bp_row, w_big)

    # (rows_pad, G*D) is a pure view of (n_pad, D); strip padding (tiny with tight
    # block sizing) and restore (B, L, D).
    out = out.reshape(n_pad, D)
    if n_pad > N:
        out = out[:N]
    return out.reshape(B, L, D)


def _reference(t, w_lin, b_lin, w_per, b_per, w_A):
    # Plain-JAX mirror of the PyTorch forward (eval mode).
    t3 = t[..., None]                                                        # (B, L, 1)
    out_lin = t3 * w_lin.reshape(()) + b_lin.reshape(())                     # Linear(1, 1)
    out_per = jnp.sin(t3 * w_per.reshape(-1) + b_per.reshape(-1)) @ w_A.T    # Linear(1,D-1).sin() @ A^T
    return jnp.concatenate([out_lin, out_per], axis=-1)


if __name__ == "__main__":
    # Small shapes consistent with the module: in_features=1, out_features=32.
    B, L = 2, 64
    out_features = 32
    Dm1 = out_features - 1

    key = jax.random.PRNGKey(0)
    k_t, k_wl, k_bl, k_wp, k_bp, k_a = jax.random.split(key, 6)

    t = jax.random.uniform(k_t, (B, L), dtype=jnp.float32) * 10.0
    w_lin = jax.random.normal(k_wl, (1, 1), dtype=jnp.float32) * 0.5     # Linear(1,1).weight
    b_lin = jax.random.normal(k_bl, (1,), dtype=jnp.float32) * 0.1       # Linear(1,1).bias
    w_per = jax.random.normal(k_wp, (Dm1, 1), dtype=jnp.float32) * 0.5   # Linear(1,D-1).weight
    b_per = jax.random.normal(k_bp, (Dm1,), dtype=jnp.float32) * 0.1     # Linear(1,D-1).bias
    w_A = jax.random.normal(k_a, (Dm1, Dm1), dtype=jnp.float32) * 0.1    # Linear(D-1,D-1,bias=False).weight

    out = time_embedding_forward(t, w_lin, b_lin, w_per, b_per, w_A)
    out = jax.block_until_ready(out)

    ref = _reference(t, w_lin, b_lin, w_per, b_per, w_A)
    np.testing.assert_allclose(np.asarray(out), np.asarray(ref), rtol=1e-5, atol=1e-5)

    print("KERNEL_OK")
</pallas_src>

<mosaic_0001>
module attributes {stable_mosaic.version = 11 : i64} {
  func.func @_time_embedding_kernel(%arg0: i32, %arg1: memref<16x4xf32, #tpu.memory_space<vmem>>, %arg2: memref<4x128xf32, #tpu.memory_space<vmem>>, %arg3: memref<1x128xf32, #tpu.memory_space<vmem>>, %arg4: memref<128x128xf32, #tpu.memory_space<vmem>>, %arg5: memref<16x128xf32, #tpu.memory_space<vmem>>) attributes {dimension_semantics = [#tpu.dimension_semantics<parallel>], iteration_bounds = array<i64: 2>, scalar_prefetch = 0 : i64, scratch_operands = 0 : i64, tpu.core_type = #tpu.core_type<tc>, window_params = [{transform_indices = @transform_0, window_bounds = array<i64: 16, 4>}, {pipeline_mode = #tpu.pipeline_mode<synchronous>, transform_indices = @transform_1, window_bounds = array<i64: 4, 128>}, {pipeline_mode = #tpu.pipeline_mode<synchronous>, transform_indices = @transform_2, window_bounds = array<i64: 1, 128>}, {pipeline_mode = #tpu.pipeline_mode<synchronous>, transform_indices = @transform_3, window_bounds = array<i64: 128, 128>}, {transform_indices = @transform_4, window_bounds = array<i64: 16, 128>}]} {
    %c0 = arith.constant 0 : index
    %c0_0 = arith.constant 0 : index
    %0 = vector.load %arg1[%c0, %c0_0] : memref<16x4xf32, #tpu.memory_space<vmem>>, vector<16x4xf32>
    %c0_1 = arith.constant 0 : index
    %c0_2 = arith.constant 0 : index
    %1 = vector.load %arg2[%c0_1, %c0_2] : memref<4x128xf32, #tpu.memory_space<vmem>>, vector<4x128xf32>
    %cst = arith.constant dense<0.000000e+00> : vector<16x128xf32>
    %2 = tpu.matmul %0, %1, %cst {dimension_numbers = #tpu.dot_dimension_numbers<[1], [0], [0], [1], [0, 0, 1, 1], [], []>} : vector<16x4xf32>, vector<4x128xf32>, vector<16x128xf32> -> vector<16x128xf32>
    %c0_3 = arith.constant 0 : index
    %c0_4 = arith.constant 0 : index
    %3 = vector.load %arg3[%c0_3, %c0_4] : memref<1x128xf32, #tpu.memory_space<vmem>>, vector<1x128xf32>
    %4 = vector.broadcast %3 : vector<1x128xf32> to vector<16x128xf32>
    %5 = arith.addf %2, %4 : vector<16x128xf32>
    %6 = math.sin %5 : vector<16x128xf32>
    %c0_5 = arith.constant 0 : index
    %c0_6 = arith.constant 0 : index
    %7 = vector.load %arg4[%c0_5, %c0_6] : memref<128x128xf32, #tpu.memory_space<vmem>>, vector<128x128xf32>
    %cst_7 = arith.constant dense<0.000000e+00> : vector<16x128xf32>
    %8 = tpu.matmul %6, %7, %cst_7 {dimension_numbers = #tpu.dot_dimension_numbers<[1], [0], [0], [1], [0, 0, 1, 1], [], []>} : vector<16x128xf32>, vector<128x128xf32>, vector<16x128xf32> -> vector<16x128xf32>
    %9 = tpu.iota {dimensions = array<i32: 1>} : vector<1x128xi32>
    %c32_i32 = arith.constant 32 : i32
    %c0_i32 = arith.constant 0 : i32
    %10 = arith.cmpi eq, %c32_i32, %c0_i32 : i32
    %c1_i32 = arith.constant 1 : i32
    %11 = arith.select %10, %c1_i32, %c32_i32 : i32
    %12 = vector.broadcast %11 : i32 to vector<1x128xi32>
    %13 = arith.remsi %9, %12 : vector<1x128xi32>
    %c0_i32_8 = arith.constant 0 : i32
    %14 = vector.broadcast %c0_i32_8 : i32 to vector<1x128xi32>
    %15 = arith.cmpi ne, %13, %14 : vector<1x128xi32>
    %c0_i32_9 = arith.constant 0 : i32
    %16 = vector.broadcast %c0_i32_9 : i32 to vector<1x128xi32>
    %17 = arith.cmpi slt, %13, %16 : vector<1x128xi32>
    %c0_i32_10 = arith.constant 0 : i32
    %18 = arith.cmpi slt, %11, %c0_i32_10 : i32
    %19 = vector.broadcast %18 : i1 to vector<1x128xi1>
    %20 = vector.broadcast %19 : vector<1x128xi1> to vector<1x128xi1>
    %21 = arith.xori %17, %20 : vector<1x128xi1>
    %22 = arith.andi %21, %15 : vector<1x128xi1>
    %23 = vector.broadcast %11 : i32 to vector<1x128xi32>
    %24 = arith.addi %13, %23 : vector<1x128xi32>
    %25 = arith.select %22, %24, %13 : vector<1x128xi1>, vector<1x128xi32>
    %c0_i32_11 = arith.constant 0 : i32
    %26 = vector.broadcast %c0_i32_11 : i32 to vector<1x128xi32>
    %27 = arith.cmpi eq, %25, %26 : vector<1x128xi32>
    %28 = arith.extui %27 : vector<1x128xi1> to vector<1x128xi32>
    %29 = arith.sitofp %28 : vector<1x128xi32> to vector<1x128xf32>
    %30 = vector.broadcast %29 : vector<1x128xf32> to vector<16x128xf32>
    %31 = arith.mulf %5, %30 : vector<16x128xf32>
    %32 = arith.addf %8, %31 : vector<16x128xf32>
    %c0_12 = arith.constant 0 : index
    %c0_13 = arith.constant 0 : index
    %33 = vector.load %arg5[%c0_12, %c0_13] : memref<16x128xf32, #tpu.memory_space<vmem>>, vector<16x128xf32>
    tpu.vector_store %arg5[%c0_12, %c0_13], %32 {strides = array<i32>} : memref<16x128xf32, #tpu.memory_space<vmem>>, vector<16x128xf32>,
    return
  }
  func.func @transform_0(%arg0: i32) -> (i32, i32) {
    %c0_i32 = arith.constant 0 : i32
    %c0_i32_0 = arith.constant 0 : i32
    return %arg0, %c0_i32 : i32, i32
  }
  func.func @transform_1(%arg0: i32) -> (i32, i32) {
    %c0_i32 = arith.constant 0 : i32
    %c0_i32_0 = arith.constant 0 : i32
    %c0_i32_1 = arith.constant 0 : i32
    return %c0_i32, %c0_i32_0 : i32, i32
  }
  func.func @transform_2(%arg0: i32) -> (i32, i32) {
    %c0_i32 = arith.constant 0 : i32
    %c0_i32_0 = arith.constant 0 : i32
    %c0_i32_1 = arith.constant 0 : i32
    return %c0_i32, %c0_i32_0 : i32, i32
  }
  func.func @transform_3(%arg0: i32) -> (i32, i32) {
    %c0_i32 = arith.constant 0 : i32
    %c0_i32_0 = arith.constant 0 : i32
    %c0_i32_1 = arith.constant 0 : i32
    return %c0_i32, %c0_i32_0 : i32, i32
  }
  func.func @transform_4(%arg0: i32) -> (i32, i32) {
    %c0_i32 = arith.constant 0 : i32
    %c0_i32_0 = arith.constant 0 : i32
    return %arg0, %c0_i32 : i32, i32
  }
}

</mosaic_0001>

<bundles_post_ra>
// kernel: tpu_custom_call.1
= control target key start
LH: loop header
LB: loop body
LE: loop exit
PB: predicated region body
PF: predicated region fallthrough
CT: control target
= control target key end

     0   :  { %9 = vsyncpa [#allocation3], 0  ;;  %s1203_s0 = inlined_call_operand.vmem [shape: f32[32,4], index: 0, kind: input, shape index: {}]   ;;  %s1204_s1 = inlined_call_operand.vmem [shape: f32[4,128], index: 1, kind: input, shape index: {}]   ;;  %s1205_s2 = inlined_call_operand.vmem [shape: f32[1,128], index: 2, kind: input, shape index: {}]   ;;  %s1206_s3 = inlined_call_operand.hbm [shape: f32[128,128], index: 3, kind: input, shape index: {}]   ;;  %s1207_s4 = inlined_call_operand.hbm [shape: f32[32,128], index: 4, kind: output, shape index: {}]  }
   0x1   :  { %10 = vsyncpa [#allocation4], 0 }
   0x2   :  { %12 = vsyncpa [#allocation4 + $0x1], 0  ;;  %s957_s15 = smov 0   ;;  %s959_s16 = smov 0  }
   0x3   :  { %s961_s17 = smov 0   ;;  %s963_s18 = smov 0  }
   0x4 LB: > { %s978_s19 = sadd.s32 4294967295, %s917_s18   ;;  %s717_s20 = sadd.s32 4294967294, %s917_s18   ;;  %s917_s18 = sphi %s963_s18, %s1215_s18   ;;  %s913_s17 = sphi %s961_s17, %s1214_s17   ;;  %s909_s16 = sphi %s959_s16, %s1213_s16   ;;  %s905_s15 = sphi %s957_s15, %s1212_s15  }
   0x5   : > { %s982_s21 = sadd.s32 1, %s917_s18   ;;  %s114_s22 = sadd.s32 1, %s913_s17 }
   0x6   : > { %s111_s23 = ssub.s32 %s917_s18, %s982_s21  ;;  %p124_p0 = scmp.ne.s32.totalorder %s913_s17, %s909_s16 }
   0x7   : > { %p112_p1 = scmp.eq.s32.totalorder %s111_s23, 0  ;;  %p125_p2 = scmp.eq.s32.totalorder %s978_s19, 1 }
   0x8   : > { %p130_p3 = scmp.ne.s32.totalorder %s909_s16, %s905_s15  ;;  %p131_p4 = scmp.eq.s32.totalorder %s717_s20, 1 }
   0x9   : > { %s993_s24 = scalar_select %p112_p1, %s913_s17, %s114_s22  }
   0xa   : > { %p995_p5 = por %p125_p2, %p124_p0  ;;  %p999_p6 = por %p131_p4, %p130_p3 }
   0xb   : > { %p718_p7 = scmp.ge.s32.totalorder %s917_s18, 1  ;;  %p138_p8 = scmp.lt.s32.totalorder %s917_s18, 3 }
   0xc   : > { %p772_p9 = scmp.eq.s32.totalorder %s978_s19, 0  ;;  %s155_s29 = sshll.u32 %s1206_s3, 4  ;;  %s156_s29 = int_to_ptr.hbm [resolvable:$true] %s155_s29 }
   0xd   : > { %p139_p10 = pnand %p718_p7, %p138_p8  ;;  %s919_s30 = smov [#allocation2]  }
   0xe   : > { %s157_s5 = sshll.u32 %s919_s30, 4  ;;  %s920_s6 = smov 128   ;;  %s158_s5 = int_to_ptr.vmem [resolvable:$true] %s157_s5 }
   0xf   : > { %p764_p11 = pneg %p139_p10  ;;  %s921_s7 = smov 8  }
  0x10   : > { %182 = sbr.rel (%p139_p10) target bundleno = 411 (0x19b), region = 36 }
  0x11   : > { %p765_p12 = pnand %p772_p9, %p764_p11 }
  0x13   : > { %767 = dma.hbm_to_vmem [thread:$0]  (!%p765_p12), %s156_s29, 2048, %s158_s5, [#allocation3], %s920_s6, %s920_s6, %s921_s7  }
  0x15   : > { %896 = dma.done.wait (%p772_p9), [#allocation3], 2048  }
  0x16   : > { %898 = vsyncadd (%p772_p9), [#allocation3], 4294965248  ;;  %s724_s8 = sshll.u32 %s978_s19, 1  ;;  %vm230_vm0 = vcmask 1043456   ;;  %vm223_vm1 = vcmask 31744   ;;  %v582_v3 = vld [vmem:[#allocation2 + $0x78] sm:$0xff] }
  0x17   : > { %p210_p13 = scmp.lt.s32.totalorder %s724_s8, 3  ;;  %v218_v0 = vld [vmem:[%s1204_s1] sm:$0xf]  ;;  %v581_v4 = vld [vmem:[#allocation2 + $0x70] sm:$0xff]  ;;  %602 = vmatpush.msra.mxu1 %v582_v3  ;;  %742 = vmatpush.msra.mxu2 %v582_v3  ;;  %v580_v5 = vld [vmem:[#allocation2 + $0x68] sm:$0xff]  ;;  %s206_s23 = sand.u32 1, %s909_s16  }
  0x18   : > { %726 = vmatpush.msk.msra.mxu0 %vm230_vm0, %v218_v0  ;;  %v579_v6 = vld [vmem:[#allocation2 + $0x60] sm:$0xff]  ;;  %v578_v8 = vld [vmem:[#allocation2 + $0x58] sm:$0xff]  ;;  %v577_v9 = vld [vmem:[#allocation2 + $0x50] sm:$0xff]  ;;  %v922_v36 = vmov 683565275   ;;  %s723_s27 = sshll.u32 %s206_s23, 4 }
  0x19   : > { %s1217_s8 = smov (!%p210_p13, %s724_s8), 3  ;;  %603 = vmatpush.msra.mxu1 %v581_v4  ;;  %743 = vmatpush.msra.mxu2 %v581_v4  ;;  %v820_v7 = vld [vmem:[%s1205_s2] ss:$0 sm:$0xff]  ;;  %v576_v12 = vld [vmem:[#allocation2 + $0x48] sm:$0xff]  ;;  %v574_v17 = vld [vmem:[#allocation2 + $0x38] sm:$0xff]  ;;  %s208_s28 = scalar_lea.vmem [#allocation5], %s723_s27 }
  0x1a   : > { %s725_s9 = sshll.u32 %s1217_s8, 3  ;;  %v575_v14 = vld [vmem:[#allocation2 + $0x40] sm:$0xff]  ;;  %v573_v20 = vld [vmem:[#allocation2 + $0x30] sm:$0xff]  ;;  %v572_v24 = vld [vmem:[#allocation2 + $0x28] sm:$0xff]  ;;  %v923_v39 = vmov 2475754826  }
  0x1b   : > { %s213_s12 = scalar_lea.vmem %s1203_s0, %s725_s9  ;;  %604 = vmatpush.msra.mxu1 %v580_v5  ;;  %744 = vmatpush.msra.mxu2 %v580_v5  ;;  %v571_v27 = vld [vmem:[#allocation2 + $0x20] sm:$0xff]  ;;  %v570_v31 = vld [vmem:[#allocation2 + $0x18] sm:$0xff]  ;;  %v569_v35 = vld [vmem:[#allocation2 + $0x10] sm:$0xff]  ;;  %v924_v41 = vmov 2131351028   ;;  %s741_s29 = sshll.u32 %s978_s19, 4 }
  0x1c   : > { %v216_v1 = vld [vmem:[%s213_s12] sm:$0xff]  ;;  %v217_v2 = vld [vmem:[%s213_s12 + $0x8] sm:$0xff]  ;;  %v925_v43 = vmov 2102212464   ;;  %v926_v49 = vmov 920167782   ;;  %s639_s6 = scalar_lea.hbm %s1207_s4, %s741_s29 }
  0x1d   : > { %727 = vmatmul.msk.f32.vlgmr.msra.gmra.mxu0 %vm223_vm1, %v216_v1  ;;  %605 = vmatpush.msra.mxu1 %v579_v6  ;;  %v568_v46 = vld [vmem:[#allocation2 + $0x8] sm:$0xff]  ;;  %v927_v53 = vmov 1326507024   ;;  %v567_v56 = vld [vmem:[#allocation2] sm:$0xff]  ;;  %s640_s7 = sshll.u32 %s208_s28, 4  ;;  %s642_s8 = sshll.u32 %s639_s6, 4  ;;  %s641_s7 = int_to_ptr.vmem [resolvable:$true] %s640_s7  ;;  %s643_s8 = int_to_ptr.hbm [resolvable:$true] %s642_s8 }
  0x1e   : > { %745 = vmatpush.msra.mxu2 %v579_v6  ;;  %s628_s9 = scalar_lea.sflag [#allocation4], %s206_s23  ;;  %s865_s10 = sshra.s32 %s643_s8, 4  ;;  %s866_s10 = int_to_ptr.hbm [resolvable:$true] %s865_s10 }
  0x1f   : > { %606 = vmatpush.msra.mxu1 %v578_v8  ;;  %s867_s11 = scalar_lea.hbm %s866_s10, 16  ;;  %s871_s13 = scalar_lea.hbm %s1207_s4, 32 }
  0x20   : > { %746 = vmatpush.msra.mxu2 %v578_v8  ;;  %p868_p0 = scmp.ne.s32.totalorder %s866_s10, %s867_s11  ;;  %p872_p3 = scmp.lt.s32.totalorder %s866_s10, %s1207_s4 }
  0x21   : > { %607 = vmatpush.msra.mxu1 %v577_v9  ;;  %p873_p4 = scmp.lt.s32.totalorder %s871_s13, %s867_s11 }
  0x22   : > { %747 = vmatpush.msra.mxu2 %v577_v9  ;;  %p869_p1 = pnand %p868_p0, %p995_p5 }
  0x23   : > { %608 = vmatpush.msra.mxu1 %v576_v12  ;;  %p874_p7 = por %p873_p4, %p872_p3 }
  0x24   : > { %748 = vmatpush.msra.mxu2 %v576_v12  ;;  %p870_p2 = pneg %p869_p1 }
  0x25   : > { %728 = vmatmul.msk.f32.gmra.mxu0 %vm223_vm1, %v217_v2  ;;  %609 = vmatpush.msra.mxu1 %v575_v14 }
  0x26   : > { %749 = vmatpush.msra.mxu2 %v575_v14  ;;  %p875_p8 = pnand %p874_p7, %p870_p2 }
  0x27   : > { %610 = vmatpush.msra.mxu1 %v574_v17 }
  0x28   : > { %750 = vmatpush.msra.mxu2 %v574_v17 }
  0x29   : > { %611 = vmatpush.msra.mxu1 %v573_v20 }
  0x2a   : > { %751 = vmatpush.msra.mxu2 %v573_v20 }
  0x2b   : > { %612 = vmatpush.msra.mxu1 %v572_v24 }
  0x2c   : > { %752 = vmatpush.msra.mxu2 %v572_v24 }
  0x2d   : > { %613 = vmatpush.msra.mxu1 %v571_v27 }
  0x2e   : > { %753 = vmatpush.msra.mxu2 %v571_v27 }
  0x2f   : > { %614 = vmatpush.msra.mxu1 %v570_v31 }
  0x30   : > { %754 = vmatpush.msra.mxu2 %v570_v31 }
  0x31   : > { %615 = vmatpush.msra.mxu1 %v569_v35 }
  0x32   : > { %755 = vmatpush.msra.mxu2 %v569_v35 }
  0x33   : > { %616 = vmatpush.msra.mxu1 %v568_v46 }
  0x34   : > { %756 = vmatpush.msra.mxu2 %v568_v46 }
  0x35   : > { %617 = vmatpush.msra.mxu1 %v567_v56 }
  0x36   : > { %757 = vmatpush.msra.mxu2 %v567_v56 }
  0x9a   : > { %v251_v10 = vpop.f32.mrf.mxu0 }
  0x9b   : > { %v1025_v11 = vadd.f32 %v820_v7, %v251_v10 }
  0x9d   : > { %v260_v13 = vand.u32 2139095040, %v1025_v11  ;;  %v257_v15 = vand.u32 2147483647, %v1025_v11 }
  0x9f   : > { %v261_v16 = vshrl.u32 %v260_v13, 23  ;;  %v264_v18 = vand.u32 8388607, %v257_v15 }
  0xa1   : > { %v729_v19 = vadd.s32 4294967169, %v261_v16  ;;  %v265_v25 = vor.u32 8388608, %v264_v18 }
  0xa2   : > { %v254_v21 = vpop.f32.mrf.mxu0 }
  0xa3   : > { %v267_v22 = vadd.s32 1, %v729_v19  ;;  %v1031_v23 = vadd.f32 %v820_v7, %v254_v21  ;;  %v1034_v32 = vshll.u32 %v265_v25, 8 }
  0xa5   : > { %vm268_vm2 = vcmp.gt.s32.totalorder %v267_v22, 0  ;;  %v415_v26 = vand.u32 2139095040, %v1031_v23  ;;  %v306_v55 = vand.u32 65535, %v1034_v32  ;;  %v412_v59 = vand.u32 2147483647, %v1031_v23 }
  0xa6   : > { %v269_v28 = vsel %vm268_vm2, %v267_v22, 0  ;;  %v307_v14 = vshrl.u32 %v1034_v32, 16 }
  0xa7   : > { %v271_v29 = vand.u32 31, %v269_v28  ;;  %v416_v30 = vshrl.u32 %v415_v26, 23  ;;  %v270_v38 = vshrl.u32 %v269_v28, 5  ;;  %v1056_v21 = vand.u32 8388607, %v412_v59 }
  0xa9   : > { %v272_v33 = vsub.s32 32, %v271_v29  ;;  %v732_v34 = vadd.s32 4294967169, %v416_v30  ;;  %v274_v37 = vshll.u32 %v922_v36, %v271_v29  ;;  %v277_v40 = vshll.u32 %v923_v39, %v271_v29 }
  0xaa   : > { %v280_v42 = vshll.u32 %v924_v41, %v271_v29  ;;  %v283_v44 = vshll.u32 %v925_v43, %v271_v29  ;;  %v286_v50 = vshll.u32 %v926_v49, %v271_v29  ;;  %vm289_vm4 = vcmp.lt.s32.totalorder %v270_v38, 1 }
  0xab   : > { %v422_v45 = vadd.s32 1, %v732_v34  ;;  %v275_v47 = vshrl.u32 %v923_v39, %v272_v33  ;;  %v278_v48 = vshrl.u32 %v924_v41, %v272_v33  ;;  %v281_v51 = vshrl.u32 %v925_v43, %v272_v33 }
  0xac   : > { %v284_v52 = vshrl.u32 %v926_v49, %v272_v33  ;;  %v287_v54 = vshrl.u32 %v927_v53, %v272_v33  ;;  %v273_v0 = vshrl.u32 %v922_v36, %v272_v33  ;;  %vm291_vm5 = vcmp.lt.s32.totalorder %v270_v38, 3 }
  0xad   : > { %vm423_vm3 = vcmp.gt.s32.totalorder %v422_v45, 0  ;;  %v276_v57 = vor.u32 %v275_v47, %v274_v37  ;;  %v279_v58 = vor.u32 %v278_v48, %v277_v40  ;;  %v282_v61 = vor.u32 %v281_v51, %v280_v42 }
  0xae   : > { %v424_v60 = vsel %vm423_vm3, %v422_v45, 0  ;;  %v285_v62 = vor.u32 %v284_v52, %v283_v44  ;;  %v288_v63 = vor.u32 %v287_v54, %v286_v50  ;;  %vm292_vm6 = vcmp.lt.s32.totalorder %v270_v38, 4 }
  0xaf   : > { %v294_v1 = vsel %vm292_vm6, %v282_v61, 2102212464  ;;  %v297_v2 = vsel %vm289_vm4, %v276_v57, %v279_v58  ;;  %v301_v4 = vsel %vm289_vm4, %v279_v58, %v282_v61  ;;  %v426_v5 = vand.u32 31, %v424_v60 }
  0xb0   : > { %v298_v3 = vsel %vm292_vm6, %v285_v62, 920167782  ;;  %vm290_vm7 = vcmp.lt.s32.totalorder %v270_v38, 2  ;;  %v302_v7 = vsel %vm292_vm6, %v288_v63, 1326507024  ;;  %v293_v8 = vsel %vm289_vm4, %v273_v0, %v276_v57 }
  0xb1   : > { %v299_v6 = vsel %vm291_vm5, %v282_v61, %v298_v3  ;;  %v295_v9 = vsel %vm291_vm5, %v279_v58, %v294_v1  ;;  %v303_v12 = vsel %vm291_vm5, %v285_v62, %v302_v7  ;;  %v1052_v18 = vshrl.u32 %v424_v60, 5 }
  0xb2   : > { %v300_v10 = vsel %vm290_vm7, %v297_v2, %v299_v6  ;;  %v304_v13 = vsel %vm290_vm7, %v301_v4, %v303_v12  ;;  %v1058_v22 = vsub.s32 32, %v426_v5  ;;  %v1061_v24 = vsel %vm290_vm7, %v293_v8, %v295_v9 }
  0xb3   : > { %v330_v16 = vand.u32 65535, %v300_v10  ;;  %v331_v17 = vshrl.u32 %v300_v10, 16  ;;  %v308_v19 = vand.u32 65535, %v304_v13  ;;  %v309_v20 = vshrl.u32 %v304_v13, 16 }
  0xb4   : > { %v429_v30 = vshll.u32 %v922_v36, %v426_v5  ;;  %v430_v46 = vshrl.u32 %v923_v39, %v1058_v22  ;;  %v928_v48 = vmov 0   ;;  %v433_v51 = vshrl.u32 %v924_v41, %v1058_v22 }
  0xb5   : > { %v333_v25 = vmul.u32 %v331_v17, %v306_v55  ;;  %v334_v26 = vmul.u32 %v330_v16, %v307_v14  ;;  %v311_v27 = vmul.u32 %v309_v20, %v306_v55  ;;  %v312_v28 = vmul.u32 %v308_v19, %v307_v14 }
  0xb6   : > { %v332_v29 = vmul.u32 %v330_v16, %v306_v55  ;;  %v310_v31 = vmul.u32 %v308_v19, %v306_v55  ;;  %v313_v33 = vmul.u32 %v309_v20, %v307_v14  ;;  %v335_v34 = vmul.u32 %v331_v17, %v307_v14 }
  0xb7   : > { %v336_v35 = vshll.u32 %v333_v25, 16  ;;  %v314_v37 = vshll.u32 %v311_v27, 16  ;;  %v315_v40 = vshrl.u32 %v311_v27, 16  ;;  %v337_v42 = vshrl.u32 %v333_v25, 16 }
  0xb8   : > { %v338_v44 = vshll.u32 %v334_v26, 16  ;;  %v316_v45 = vshll.u32 %v312_v28, 16  ;;  %v432_v55 = vshll.u32 %v923_v39, %v426_v5  ;;  %v1072_v58 = vor.u32 %v430_v46, %v429_v30 }
  0xb9   : > { %vm340_vm8 = vc.u32 %v332_v29, %v336_v35  ;;  %v342_v38 = vadd.s32 %v336_v35, %v332_v29  ;;  %vm318_vm9 = vc.u32 %v310_v31, %v314_v37  ;;  %v320_v47 = vadd.s32 %v314_v37, %v310_v31 }
  0xba   : > { %v341_v50 = vsel %vm340_vm8, 1, %v928_v48  ;;  %v319_v52 = vsel %vm318_vm9, 1, %v928_v48  ;;  %v1075_v62 = vor.u32 %v433_v51, %v432_v55  ;;  %v435_v63 = vshll.u32 %v924_v41, %v426_v5 }
  0xbb   : > { %v343_v54 = vadd.s32 %v341_v50, %v335_v34  ;;  %vm344_vm10 = vc.u32 %v342_v38, %v338_v44  ;;  %v321_v56 = vadd.s32 %v319_v52, %v313_v33  ;;  %vm322_vm11 = vc.u32 %v320_v47, %v316_v45 }
  0xbc   : > { %v345_v57 = vsel %vm344_vm10, 1, %v928_v48  ;;  %v323_v60 = vsel %vm322_vm11, 1, %v928_v48  ;;  %v436_v1 = vshrl.u32 %v925_v43, %v1058_v22  ;;  %v438_v2 = vshll.u32 %v925_v43, %v426_v5 }
  0xbd   : > { %v347_v61 = vadd.s32 %v345_v57, %v343_v54  ;;  %v325_v0 = vadd.s32 %v323_v60, %v321_v56  ;;  %v439_v39 = vshrl.u32 %v926_v49, %v1058_v22  ;;  %v339_v3 = vshrl.u32 %v334_v26, 16 }
  0xbe   : > { %v441_v6 = vshll.u32 %v926_v49, %v426_v5  ;;  %v442_v7 = vshrl.u32 %v927_v53, %v1058_v22  ;;  %v317_v8 = vshrl.u32 %v312_v28, 16  ;;  %v437_v10 = vor.u32 %v436_v1, %v435_v63 }
  0xbf   : > { %v348_v4 = vadd.s32 %v347_v61, %v337_v42  ;;  %v326_v9 = vadd.s32 %v325_v0, %v315_v40  ;;  %v440_v41 = vor.u32 %v439_v39, %v438_v2  ;;  %v420_v13 = vor.u32 8388608, %v1056_v21 }
  0xc0   : > { %v443_v14 = vor.u32 %v442_v7, %v441_v6  ;;  %vm444_vm12 = vcmp.lt.s32.totalorder %v1052_v18, 1  ;;  %v1090_v16 = vadd.s32 %v342_v38, %v338_v44  ;;  %vm447_vm13 = vcmp.lt.s32.totalorder %v1052_v18, 4 }
  0xc1   : > { %v349_v12 = vadd.s32 %v348_v4, %v339_v3  ;;  %v1088_v43 = vadd.s32 %v326_v9, %v317_v8  ;;  %v452_v49 = vsel %vm444_vm12, %v1072_v58, %v1075_v62  ;;  %v350_v53 = vmul.u32 %v1034_v32, %v1061_v24 }
  0xc2   : > { %vm446_vm14 = vcmp.lt.s32.totalorder %v1052_v18, 3  ;;  %v453_v17 = vsel %vm447_vm13, %v440_v41, 920167782  ;;  %vm445_vm0 = vcmp.lt.s32.totalorder %v1052_v18, 2  ;;  %v456_v20 = vsel %vm444_vm12, %v1075_v62, %v437_v10 }
  0xc3   : > { %v353_v5 = vadd.s32 1, %v349_v12  ;;  %vm352_vm15 = vc.u32 %v1088_v43, %v1090_v16  ;;  %v454_v19 = vsel %vm446_vm14, %v437_v10, %v453_v17  ;;  %v457_v24 = vsel %vm447_vm13, %v443_v14, 1326507024 }
  0xc4   : > { %v455_v32 = vsel %vm445_vm0, %v452_v49, %v454_v19  ;;  %v1114_v25 = vshll.u32 %v420_v13, 8  ;;  %v458_v27 = vsel %vm446_vm14, %v440_v41, %v457_v24  ;;  %v428_v39 = vshrl.u32 %v922_v36, %v1058_v22 }
  0xc5   : > { %v354_v21 = vsel %vm352_vm15, %v353_v5, %v349_v12  ;;  %v485_v28 = vand.u32 65535, %v455_v32  ;;  %v486_v29 = vshrl.u32 %v455_v32, 16  ;;  %v459_v30 = vsel %vm445_vm0, %v456_v20, %v458_v27 }
  0xc6   : > { %v355_v26 = vadd.s32 %v354_v21, %v350_v53  ;;  %v461_v31 = vand.u32 65535, %v1114_v25  ;;  %v462_v34 = vshrl.u32 %v1114_v25, 16  ;;  %v463_v35 = vand.u32 65535, %v459_v30 }
  0xc7   : > { %v464_v37 = vshrl.u32 %v459_v30, 16  ;;  %v449_v4 = vsel %vm447_vm13, %v437_v10, 2102212464  ;;  %v448_v36 = vsel %vm444_vm12, %v428_v39, %v1072_v58  ;;  %v351_v58 = vadd.s32 %v1090_v16, %v1088_v43 }
  0xc8   : > { %v356_v33 = vadd.s32 536870912, %v355_v26  ;;  %v488_v40 = vmul.u32 %v486_v29, %v461_v31  ;;  %v489_v45 = vmul.u32 %v485_v28, %v462_v34  ;;  %v467_v38 = vmul.u32 %v463_v35, %v462_v34 }
  0xc9   : > { %v466_v44 = vmul.u32 %v464_v37, %v461_v31  ;;  %v487_v46 = vmul.u32 %v485_v28, %v461_v31  ;;  %v465_v51 = vmul.u32 %v463_v35, %v461_v31  ;;  %v468_v54 = vmul.u32 %v464_v37, %v462_v34 }
  0xca   : > { %v1122_v42 = vshrl.u32 %v356_v33, 30  ;;  %v491_v47 = vshll.u32 %v488_v40, 16  ;;  %v490_v55 = vmul.u32 %v486_v29, %v462_v34  ;;  %v493_v60 = vshll.u32 %v489_v45, 16 }
  0xcb   : > { %v469_v52 = vshll.u32 %v466_v44, 16  ;;  %v471_v61 = vshll.u32 %v467_v38, 16  ;;  %v492_v9 = vshrl.u32 %v488_v40, 16  ;;  %v470_v13 = vshrl.u32 %v466_v44, 16 }
  0xcc   : > { %v358_v50 = vshll.u32 %v1122_v42, 30  ;;  %vm495_vm1 = vc.u32 %v487_v46, %v491_v47  ;;  %v497_v1 = vadd.s32 %v491_v47, %v487_v46  ;;  %v450_v22 = vsel %vm446_vm14, %v1075_v62, %v449_v4 }
  0xcd   : > { %vm473_vm2 = vc.u32 %v465_v51, %v469_v52  ;;  %v475_v57 = vadd.s32 %v469_v52, %v465_v51  ;;  %v496_v0 = vsel %vm495_vm1, 1, %v928_v48  ;;  %v472_v10 = vshrl.u32 %v467_v38, 16 }
  0xce   : > { %v359_v56 = vsub.s32 %v355_v26, %v358_v50  ;;  %v474_v63 = vsel %vm473_vm2, 1, %v928_v48  ;;  %v498_v6 = vadd.s32 %v496_v0, %v490_v55  ;;  %vm499_vm5 = vc.u32 %v497_v1, %v493_v60 }
  0xcf   : > { %v476_v3 = vadd.s32 %v474_v63, %v468_v54  ;;  %vm477_vm4 = vc.u32 %v475_v57, %v471_v61  ;;  %v500_v41 = vsel %vm499_vm5, 1, %v928_v48  ;;  %v494_v17 = vshrl.u32 %v489_v45, 16 }
  0xd0   : > { %vm360_vm3 = vcmp.lt.s32.totalorder %v359_v56, 0  ;;  %v361_v2 = vsub.s32 0, %v359_v56  ;;  %v478_v8 = vsel %vm477_vm4, 1, %v928_v48  ;;  %v502_v49 = vadd.s32 %v500_v41, %v498_v6 }
  0xd1   : > { %v480_v14 = vadd.s32 %v478_v8, %v476_v3  ;;  %v451_v32 = vsel %vm445_vm0, %v448_v36, %v450_v22  ;;  %v501_v24 = vadd.s32 %v497_v1, %v493_v60  ;;  %vm259_vm8 = vcmp.lt.s32.totalorder %v1025_v11, 0 }
  0xd2   : > { %v362_v7 = vsel %vm360_vm3, %v361_v2, %v359_v56  ;;  %v503_v19 = vadd.s32 %v502_v49, %v492_v9  ;;  %v505_v31 = vmul.u32 %v1114_v25, %v451_v32  ;;  %vm1150_vm9 = vcmp.le.f32.partialorder %v257_v15, 0.7853982 }
  0xd3   : > { %v363_v12 = vclz %v362_v7  ;;  %v481_v5 = vadd.s32 %v480_v14, %v470_v13  ;;  %v381_v52 = vsub.s32 4, %v1122_v42  ;;  %vm400_vm15 = vweird.f32 %v1025_v11 }
  0xd4   : > { %v504_v48 = vadd.s32 %v503_v19, %v494_v17  ;;  %vm414_vm0 = vcmp.lt.s32.totalorder %v1031_v23, 0  ;;  %vm413_vm1 = vcmp.le.f32.partialorder %v412_v59, 0.7853982  ;;  %vm555_vm5 = vweird.f32 %v1031_v23 }
  0xd5   : > { %v730_v53 = vadd.s32 4294967294, %v363_v12  ;;  %v482_v20 = vadd.s32 %v481_v5, %v472_v10  ;;  %v382_v63 = vsel %vm259_vm8, %v381_v52, %v1122_v42 }
  0xd6   : > { %v508_v62 = vadd.s32 1, %v504_v48  ;;  %v384_v2 = vsel %vm1150_vm9, 0, %v382_v63 }
  0xd7   : > { %vm731_vm6 = vcmp.lt.s32.totalorder %v730_v53, 0  ;;  %vm507_vm7 = vc.u32 %v482_v20, %v501_v24  ;;  %v506_v6 = vadd.s32 %v501_v24, %v482_v20  ;;  %v401_v12 = vadd.s32 3, %v384_v2 }
  0xd8   : > { %v366_v21 = vsel %vm731_vm6, 0, %v730_v53  ;;  %v509_v33 = vsel %vm507_vm7, %v508_v62, %v504_v48  ;;  %v929_v2 = vmov 0.0  }
  0xd9   : > { %v367_v26 = vsub.s32 32, %v366_v21  ;;  %v371_v27 = vsub.s32 4294967266, %v366_v21  ;;  %v368_v28 = vshll.u32 %v359_v56, %v366_v21  ;;  %v510_v37 = vadd.s32 %v509_v33, %v505_v31 }
  0xda   : > { %v402_v17 = vand.u32 3, %v401_v12 }
  0xdb   : > { %v369_v29 = vshrl.u32 %v351_v58, %v367_v26  ;;  %v372_v30 = vadd.s32 127, %v371_v27  ;;  %v511_v18 = vadd.s32 536870912, %v510_v37 }
  0xdc   : > { %vm404_vm12 = vcmp.eq.s32.totalorder %v402_v17, 0  ;;  %vm407_vm13 = vcmp.eq.s32.totalorder %v402_v17, 2  ;;  %vm403_vm14 = vcmp.lt.s32.totalorder %v402_v17, 2 }
  0xdd   : > { %v370_v34 = vor.u32 %v369_v29, %v368_v28  ;;  %v373_v35 = vshll.u32 %v372_v30, 23  ;;  %v1144_v38 = vshrl.u32 %v511_v18, 30 }
  0xdf   : > { %v374_v40 = vor.u32 4788187, %v373_v35  ;;  %v377_v45 = vcvt.s32.f32 %v370_v34  ;;  %v513_v16 = vshll.u32 %v1144_v38, 30  ;;  %v536_v31 = vsub.s32 4, %v1144_v38 }
  0xe1   : > { %v375_v44 = vand.u32 2147483647, %v374_v40  ;;  %v514_v47 = vsub.s32 %v510_v37, %v513_v16  ;;  %v537_v40 = vsel %vm414_vm0, %v536_v31, %v1144_v38 }
  0xe3   : > { %v378_v43 = vmul.f32 %v377_v45, %v375_v44  ;;  %vm515_vm10 = vcmp.lt.s32.totalorder %v514_v47, 0  ;;  %v516_v51 = vsub.s32 0, %v514_v47  ;;  %v539_v45 = vsel %vm413_vm1, 0, %v537_v40 }
  0xe4   : > { %v556_v25 = vadd.s32 3, %v539_v45 }
  0xe5   : > { %v379_v46 = vxor.u32 2147483648, %v378_v43  ;;  %v517_v56 = vsel %vm515_vm10, %v516_v51, %v514_v47 }
  0xe6   : > { %v518_v57 = vclz %v517_v56 }
  0xe7   : > { %v380_v50 = vsel %vm259_vm8, %v379_v46, %v378_v43 }
  0xe8   : > { %v383_v54 = vsel %vm1150_vm9, %v1025_v11, %v380_v50  ;;  %v733_v15 = vadd.s32 4294967294, %v518_v57 }
  0xe9   : > { %v385_v55 = vmul.f32 %v383_v54, %v383_v54 }
  0xea   : > { %vm734_vm11 = vcmp.lt.s32.totalorder %v733_v15, 0 }
  0xeb   : > { %v386_v60 = vmul.f32 -0.001358992, %v385_v55  ;;  %v393_v61 = vmul.f32 -0.00019511016, %v385_v55  ;;  %v521_v4 = vsel %vm734_vm11, 0, %v733_v15  ;;  %v583_v15 = vlaneseq }
  0xec   : > { %v522_v7 = vsub.s32 32, %v521_v4  ;;  %v526_v8 = vsub.s32 4294967266, %v521_v4  ;;  %v523_v13 = vshll.u32 %v514_v47, %v521_v4 }
  0xed   : > { %v387_v0 = vadd.f32 0.041655596, %v386_v60  ;;  %v394_v1 = vadd.f32 0.008332121, %v393_v61 }
  0xee   : > { %v524_v14 = vshrl.u32 %v506_v6, %v522_v7  ;;  %v527_v49 = vadd.s32 127, %v526_v8 }
  0xef   : > { %v388_v39 = vmul.f32 %v387_v0, %v385_v55  ;;  %v395_v3 = vmul.f32 %v394_v1, %v385_v55  ;;  %v584_v0 = vand.u32 127, %v583_v15 }
  0xf0   : > { %v525_v22 = vor.u32 %v524_v14, %v523_v13  ;;  %v528_v10 = vshll.u32 %v527_v49, 23 }
  0xf1   : > { %v389_v9 = vadd.f32 -0.4999988, %v388_v39  ;;  %v396_v41 = vadd.f32 -0.16666654, %v395_v3  ;;  %v589_v1 = vand.u32 31, %v584_v0 }
  0xf2   : > { %v529_v19 = vor.u32 4788187, %v528_v10  ;;  %v532_v20 = vcvt.s32.f32 %v525_v22 }
  0xf3   : > { %v390_v42 = vmul.f32 %v389_v9, %v385_v55  ;;  %v397_v36 = vmul.f32 %v396_v41, %v385_v55  ;;  %vm597_vm6 = vcmp.eq.s32.totalorder %v589_v1, 0 }
  0xf4   : > { %v530_v32 = vand.u32 2147483647, %v529_v19  ;;  %v735_v39 = vsel %vm597_vm6, 1.0, %v929_v2 }
  0xf5   : > { %v391_v53 = vadd.f32 1.0, %v390_v42  ;;  %v398_v5 = vadd.f32 1.0, %v397_v36  ;;  %v600_v3 = vmul.f32 %v735_v39, %v1025_v11  ;;  %v601_v7 = vmul.f32 %v735_v39, %v1031_v23 }
  0xf6   : > { %v533_v58 = vmul.f32 %v532_v20, %v530_v32 }
  0xf7   : > { %v399_v48 = vmul.f32 %v398_v5, %v383_v54  ;;  %v408_v21 = vxor.u32 2147483648, %v391_v53  ;;  %v557_v54 = vand.u32 3, %v556_v25 }
  0xf8   : > { %v534_v28 = vxor.u32 2147483648, %v533_v58 }
  0xf9   : > { %v405_v24 = vxor.u32 2147483648, %v399_v48  ;;  %v409_v27 = vsel %vm407_vm13, %v408_v21, %v399_v48  ;;  %vm559_vm2 = vcmp.eq.s32.totalorder %v557_v54, 0  ;;  %vm562_vm3 = vcmp.eq.s32.totalorder %v557_v54, 2 }
  0xfa   : > { %v535_v30 = vsel %vm414_vm0, %v534_v28, %v533_v58  ;;  %vm558_vm4 = vcmp.lt.s32.totalorder %v557_v54, 2 }
  0xfb   : > { %v406_v26 = vsel %vm404_vm12, %v391_v53, %v405_v24  ;;  %v538_v33 = vsel %vm413_vm1, %v1031_v23, %v535_v30 }
  0xfc   : > { %v410_v62 = vsel %vm403_vm14, %v406_v26, %v409_v27  ;;  %v540_v34 = vmul.f32 %v538_v33, %v538_v33 }
  0xfd   : > { %v411_v29 = vsel %vm400_vm15, nan, %v410_v62 }
  0xfe   : > { %618 = vmatmul.f32.vlgmr.msra.gmra.mxu1 %v411_v29  ;;  %v541_v35 = vmul.f32 -0.001358992, %v540_v34  ;;  %v548_v37 = vmul.f32 -0.00019511016, %v540_v34 }
 0x100   : > { %v542_v18 = vadd.f32 0.041655596, %v541_v35  ;;  %v549_v44 = vadd.f32 0.008332121, %v548_v37 }
 0x102   : > { %v543_v43 = vmul.f32 %v542_v18, %v540_v34  ;;  %v550_v16 = vmul.f32 %v549_v44, %v540_v34 }
 0x104   : > { %v544_v46 = vadd.f32 -0.4999988, %v543_v43  ;;  %v551_v47 = vadd.f32 -0.16666654, %v550_v16 }
 0x106   : > { %v545_v50 = vmul.f32 %v544_v46, %v540_v34  ;;  %v552_v59 = vmul.f32 %v551_v47, %v540_v34 }
 0x108   : > { %v546_v51 = vadd.f32 1.0, %v545_v50  ;;  %v553_v52 = vadd.f32 1.0, %v552_v59 }
 0x10a   : > { %v554_v55 = vmul.f32 %v553_v52, %v538_v33  ;;  %v563_v56 = vxor.u32 2147483648, %v546_v51 }
 0x10c   : > { %v560_v57 = vxor.u32 2147483648, %v554_v55  ;;  %v564_v60 = vsel %vm562_vm3, %v563_v56, %v554_v55 }
 0x10e   : > { %v561_v38 = vsel %vm559_vm2, %v546_v51, %v560_v57 }
 0x10f   : > { %v565_v61 = vsel %vm558_vm4, %v561_v38, %v564_v60 }
 0x110   : > { %v566_v63 = vsel %vm555_vm5, nan, %v565_v61 }
 0x111   : > { %621 = vmatmul.f32.vlgmr.msra.gmra.mxu2 %v566_v63 }
 0x17b   : > { %v619_v4 = vpop.f32.mrf.mxu1 }
 0x17c   : > { %v620_v6 = vadd.f32 %v619_v4, %v600_v3 }
 0x17e   : > { %625 = vst [vmem:[%s208_s28] sm:$0xff] %v620_v6 }
 0x194   : > { %v622_v8 = vpop.f32.mrf.mxu2 }
 0x195   : > { %v623_v9 = vadd.f32 %v622_v8, %v601_v7 }
 0x197   : > { %626 = vst [vmem:[%s208_s28 + $0x8] sm:$0xff] %v623_v9 }
 0x198   : > { %878 = shalt.err (!%p875_p8)
}
 0x199   : > { %s930_s22 = smov 128   ;;  %s931_s23 = smov 8  }
 0x19a   : > { %762 = dma.vmem_to_hbm [thread:$0]  (%p995_p5), %s641_s7, 256, %s643_s8, %s628_s9, %s930_s22, %s930_s22, %s931_s23  }
 0x19b PF: > { %p774_p9 = scmp.ge.s32.totalorder %s917_s18, 2  ;;  %s657_s27 = sand.u32 1, %s905_s15  }
 0x19c   : > { %s658_s28 = scalar_lea.sflag [#allocation4], %s657_s27 }
 0x19d   : > { %p769_p10 = pnand %p774_p9, %p999_p6 }
 0x19f   : > { %p770_p11 = pneg %p769_p10 }
 0x1a1   : > { %900 = dma.done.wait (%p770_p11), %s658_s28, 256  }
 0x1a2   : > { %902 = vsyncadd (%p770_p11), %s658_s28, 4294967040  ;;  %p15_p12 = scmp.ge.s32.totalorder %s982_s21, 4   ;;  %s1212_s15 = smov %s909_s16 }
 0x1a3   : > { %s1213_s16 = smov %s913_s17  ;;  %s1214_s17 = smov %s993_s24 }
 0x1a4   : > { %s1215_s18 = smov %s982_s21  ;;  %17 = sbr.rel (!%p15_p12) target bundleno = 4 (0x4), region = 76 }
 0x1a9   :  { %664 = vsyncpa [#allocation3], 1 }
 0x1aa   :  { %666 = vsyncpa [#allocation3 + $0x1], 1 }
 0x1ab   :  { %667 = vsyncpa [#allocation4], 1 }
 0x1ac   :  { %669 = vsyncpa [#allocation4 + $0x1], 1 }

</bundles_post_ra>
